<compile_context>
chip_gen: v6e
topology: v6e:2x2x1
jax: 0.10.0
libtpu: 0.0.40
codegen_flags: <defaults>
</compile_context>

<pallas_src>
import functools

import jax
import jax.numpy as jnp
from jax.experimental import pallas as pl
from jax.experimental.pallas import tpu as pltpu


def _tpu_budget():
    """Generation-dependent caps: (max tile rows, vmem_limit_bytes)."""
    try:
        vmem = pltpu.get_tpu_info().vmem_capacity_bytes
    except Exception:
        vmem = 64 * 1024 * 1024                     # conservative (v7x-sized) fallback
    if vmem >= 100 * 1024 * 1024:                   # v5e / v6e: 128 MiB VMEM
        return 8192, 96 * 1024 * 1024
    return 4096, 48 * 1024 * 1024                   # v7x: 64 MiB VMEM per TensorCore


_MAX_TILE_ROWS, _VMEM_LIMIT_BYTES = _tpu_budget()


def _pick_tile_rows(rows, requested, max_tr):
    """Choose a sublane-aligned row-tile size.

    Guarantees >= 2 grid steps when possible (v7x megacore + pipelining) and
    prefers a tile that divides `rows` exactly (no padding, no post-kernel slice),
    without shrinking below half the requested size to find a divisor.
    """
    tgt = min(requested, max_tr, max(8, ((rows + 7) // 8) * 8))
    if rows >= 16:
        tgt = min(tgt, rows // 2)                   # at least 2 grid steps
    tgt = max(8, (tgt // 8) * 8)
    if rows % 8 == 0:
        cand, floor = tgt, max(8, tgt // 2)
        while cand >= floor:
            if rows % cand == 0:
                return cand
            cand -= 8
    return tgt


def _emd_kernel(x_ref, w1cat_ref, b1_ref, w2_ref, b2_ref, wdec_ref, out_ref, *, pf):
    """Fused encoder -> masker -> apply_masks -> decoder on packed rows.

    x_ref     : (R, 128)          f32   packed waveform rows (P frames of K samples)
    w1cat_ref : (128, P*F + P*H)  bf16  [block-diag encoder | encoder folded into L1]
    b1_ref    : (1, P*H)          f32   tiled masker layer-1 bias
    w2_ref    : (P*H, P*F)        bf16  block-diag masker layer-2 weight
    b2_ref    : (1, P*F)          f32   tiled masker layer-2 bias
    wdec_ref  : (P*F, 128)        bf16  block-diag decoder filterbank
    out_ref   : (R, 128)          bf16  decoded packed waveform rows
    """
    x = x_ref[...].astype(jnp.bfloat16)                                 # cast on VPU

    # --- forward_encoder + masker layer 1 in ONE MXU pass (shared LHS) -----------
    sh = jnp.dot(x, w1cat_ref[...],
                 preferred_element_type=jnp.float32)                    # (R, P*(F+H))
    # enc_activation: linear (encoder_activation=None) -> identity
    spec = sh[:, :pf].astype(jnp.bfloat16)          # keep spec bf16 -> half live bytes
    h = jnp.maximum(sh[:, pf:] + b1_ref[...], 0.0)                      # (R, P*H) f32

    # --- forward_masker layer 2 + sigmoid -----------------------------------------
    logits = jnp.dot(h.astype(jnp.bfloat16), w2_ref[...],
                     preferred_element_type=jnp.float32) + b2_ref[...]  # (R, P*F)
    mask = jax.nn.sigmoid(logits)

    # --- apply_masks: est_masks * tf_rep -------------------------------------------
    masked = (mask * spec.astype(jnp.float32)).astype(jnp.bfloat16)     # (R, P*F)

    # --- forward_decoder: ConvTranspose1d (kernel==stride) --------------------------
    out_ref[...] = jnp.dot(masked, wdec_ref[...],
                           preferred_element_type=jnp.float32
                           ).astype(out_ref.dtype)                      # (R, 128)


@functools.partial(jax.jit,
                   static_argnames=("n_filters", "kernel_size", "hidden",
                                    "tile_rows", "out_dtype"))
def emd_mvdr_forward(wav, wenc, w1, b1, w2, b2, wdec, *,
                     n_filters, kernel_size, hidden, tile_rows=2048,
                     out_dtype=jnp.bfloat16):
    """Full BaseEncoderMaskerDecoder_MVDR.forward for 2D wav input (B, T)."""
    # _unsqueeze_to_3d: (B, T) -> (B, 1, T)   [c = 1 channel]
    B, T = wav.shape
    K = kernel_size
    F = n_filters
    H = hidden
    assert 128 % K == 0, "kernel_size must divide 128 for lane-dense packing"
    P = 128 // K                       # frames packed per 128-lane row
    assert T % 128 == 0, "time length must be a multiple of 128 samples"
    rows = (B * T) // 128              # batch*time-flattened packed rows
    PF, PH = P * F, P * H

    f32 = jnp.float32
    bf16 = jnp.bfloat16

    # --- wrapper-side weight prep (lane-dense, block-diagonal over P frames) ------
    wencT = wenc.astype(f32).T                          # (K, F)
    wenc1 = wencT @ w1.astype(f32).T                    # (K, H) encoder folded into L1
    eyeP = jnp.eye(P, dtype=f32)
    wenc_big = jnp.kron(eyeP, wencT)                    # (128, P*F)
    wenc1_big = jnp.kron(eyeP, wenc1)                   # (128, P*H)
    # One concatenated RHS: single MXU weight-push / drain for the shared-LHS pass.
    # (If P*F is not 128-aligned the in-kernel slice is a relayout: correct, slower.)
    w1cat_big = jnp.concatenate([wenc_big, wenc1_big], axis=1).astype(bf16)
    w2_big = jnp.kron(eyeP, w2.astype(f32).T).astype(bf16)      # (P*H, P*F)
    wdec_big = jnp.kron(eyeP, wdec.astype(f32)).astype(bf16)    # (P*F, 128)
    b1_big = jnp.tile(b1.astype(f32), P).reshape(1, PH)
    b2_big = jnp.tile(b2.astype(f32), P).reshape(1, PF)

    # --- lane-dense packed waveform (f32: no extra wrapper cast pass) --------------
    x_packed = wav.astype(f32).reshape(rows, 128)

    tr = _pick_tile_rows(rows, tile_rows, _MAX_TILE_ROWS)
    rows_padded = ((rows + tr - 1) // tr) * tr
    if rows_padded != rows:
        x_packed = jnp.pad(x_packed, ((0, rows_padded - rows), (0, 0)))
    n_tiles = rows_padded // tr

    # Advisory cost estimate (actual kron-inflated MXU flops / HBM bytes).
    out_bytes = jnp.dtype(out_dtype).itemsize
    flops = 2 * rows_padded * (128 * (PF + PH) + PH * PF + PF * 128)
    transcendentals = rows_padded * PF
    bytes_accessed = (
        rows_padded * 128 * 4                 # f32 input
        + rows_padded * 128 * out_bytes       # output
        + 2 * (w1cat_big.size + w2_big.size + wdec_big.size)
        + 4 * (b1_big.size + b2_big.size))

    kernel = functools.partial(_emd_kernel, pf=PF)

    out_packed = pl.pallas_call(
        kernel,
        out_shape=jax.ShapeDtypeStruct((rows_padded, 128), out_dtype),
        grid_spec=pltpu.PrefetchScalarGridSpec(
            num_scalar_prefetch=0,
            grid=(n_tiles,),
            in_specs=[
                pl.BlockSpec((tr, 128), lambda r: (r, 0)),
                pl.BlockSpec((128, PF + PH), lambda r: (0, 0)),
                pl.BlockSpec((1, PH), lambda r: (0, 0)),
                pl.BlockSpec((PH, PF), lambda r: (0, 0)),
                pl.BlockSpec((1, PF), lambda r: (0, 0)),
                pl.BlockSpec((PF, 128), lambda r: (0, 0)),
            ],
            out_specs=pl.BlockSpec((tr, 128), lambda r: (r, 0)),
        ),
        compiler_params=pltpu.CompilerParams(
            dimension_semantics=("parallel",),
            vmem_limit_bytes=_VMEM_LIMIT_BYTES),
        cost_estimate=pl.CostEstimate(flops=flops,
                                      transcendentals=transcendentals,
                                      bytes_accessed=bytes_accessed),
    )(x_packed, w1cat_big, b1_big, w2_big, b2_big, wdec_big)

    # Glue: drop padding (only if any), overlap-add (kernel==stride => reshape),
    # pad_x_to_y is identity here, restore asteroid output shape:
    # decoded (B, 1, T) -> .unsqueeze(1) -> (B, 1, 1, T).
    if rows_padded != rows:
        out_packed = out_packed[:rows]
    decoded = out_packed.reshape(B, 1, T)
    reconstructed = decoded[:, None, :, :]
    return reconstructed


def _jax_reference(wav, wenc, w1, b1, w2, b2, wdec, K):
    """Plain-JAX f32 reference for correctness check."""
    B, T = wav.shape
    T_enc = T // K
    frames = wav.reshape(B, T_enc, K)
    spec = jnp.einsum("btk,fk->btf", frames, wenc)
    h = jnp.maximum(jnp.einsum("btf,hf->bth", spec, w1) + b1, 0.0)
    mask = jax.nn.sigmoid(jnp.einsum("bth,fh->btf", h, w2) + b2)
    masked = mask * spec
    out = jnp.einsum("btf,fk->btk", masked, wdec).reshape(B, 1, T)
    return out[:, None, :, :]


if __name__ == "__main__":
    # Small shapes: batch=2, time=4096, n_filters=32, kernel=stride=16, hidden=32.
    # rows = 64 -> tile selection picks tr=32 (2 grid steps, no padding).
    B, T = 2, 4096
    F, K, H = 32, 16, 32

    key = jax.random.PRNGKey(0)
    k_wav, k_enc, k_w1, k_b1, k_w2, k_b2, k_dec = jax.random.split(key, 7)

    wav = jax.random.normal(k_wav, (B, T), dtype=jnp.float32)
    wenc = jax.random.normal(k_enc, (F, K), dtype=jnp.float32) * 0.1   # Conv1d weight (F,1,K) squeezed
    w1 = jax.random.normal(k_w1, (H, F), dtype=jnp.float32) * 0.1
    b1 = jax.random.normal(k_b1, (H,), dtype=jnp.float32) * 0.01
    w2 = jax.random.normal(k_w2, (F, H), dtype=jnp.float32) * 0.1
    b2 = jax.random.normal(k_b2, (F,), dtype=jnp.float32) * 0.01
    wdec = jax.random.normal(k_dec, (F, K), dtype=jnp.float32) * 0.1   # ConvTranspose1d weight (F,1,K) squeezed

    out = emd_mvdr_forward(wav, wenc, w1, b1, w2, b2, wdec,
                           n_filters=F, kernel_size=K, hidden=H)
    out = jax.block_until_ready(out)

    ref = _jax_reference(wav, wenc, w1, b1, w2, b2, wdec, K)
    assert out.shape == (B, 1, 1, T), out.shape
    # bf16 matmul operands + bf16 output (f32 accumulation) => relaxed tolerance.
    assert jnp.allclose(out.astype(jnp.float32), ref, atol=2e-2, rtol=2e-2), \
        "mismatch vs reference"

    print("KERNEL_OK")
</pallas_src>

<mosaic_0001>
module attributes {stable_mosaic.version = 11 : i64} {
  func.func @_emd_kernel(%arg0: i32, %arg1: memref<32x128xf32, #tpu.memory_space<vmem>>, %arg2: memref<128x512xbf16, #tpu.memory_space<vmem>>, %arg3: memref<1x256xf32, #tpu.memory_space<vmem>>, %arg4: memref<256x256xbf16, #tpu.memory_space<vmem>>, %arg5: memref<1x256xf32, #tpu.memory_space<vmem>>, %arg6: memref<256x128xbf16, #tpu.memory_space<vmem>>, %arg7: memref<32x128xbf16, #tpu.memory_space<vmem>>) attributes {dimension_semantics = [#tpu.dimension_semantics<parallel>], iteration_bounds = array<i64: 2>, scalar_prefetch = 0 : i64, scratch_operands = 0 : i64, tpu.core_type = #tpu.core_type<tc>, window_params = [{transform_indices = @transform_0, window_bounds = array<i64: 32, 128>}, {pipeline_mode = #tpu.pipeline_mode<synchronous>, transform_indices = @transform_1, window_bounds = array<i64: 128, 512>}, {pipeline_mode = #tpu.pipeline_mode<synchronous>, transform_indices = @transform_2, window_bounds = array<i64: 1, 256>}, {pipeline_mode = #tpu.pipeline_mode<synchronous>, transform_indices = @transform_3, window_bounds = array<i64: 256, 256>}, {pipeline_mode = #tpu.pipeline_mode<synchronous>, transform_indices = @transform_4, window_bounds = array<i64: 1, 256>}, {pipeline_mode = #tpu.pipeline_mode<synchronous>, transform_indices = @transform_5, window_bounds = array<i64: 256, 128>}, {transform_indices = @transform_6, window_bounds = array<i64: 32, 128>}]} {
    %c0 = arith.constant 0 : index
    %c0_0 = arith.constant 0 : index
    %0 = vector.load %arg1[%c0, %c0_0] : memref<32x128xf32, #tpu.memory_space<vmem>>, vector<32x128xf32>
    %1 = arith.truncf %0 : vector<32x128xf32> to vector<32x128xbf16>
    %c0_1 = arith.constant 0 : index
    %c0_2 = arith.constant 0 : index
    %2 = vector.load %arg2[%c0_1, %c0_2] : memref<128x512xbf16, #tpu.memory_space<vmem>>, vector<128x512xbf16>
    %cst = arith.constant dense<0.000000e+00> : vector<32x512xf32>
    %3 = tpu.matmul %1, %2, %cst {dimension_numbers = #tpu.dot_dimension_numbers<[1], [0], [0], [1], [0, 0, 1, 1], [], []>} : vector<32x128xbf16>, vector<128x512xbf16>, vector<32x512xf32> -> vector<32x512xf32>
    %4 = vector.extract_strided_slice %3 {offsets = [0, 0], sizes = [32, 256], strides = [1, 1]} : vector<32x512xf32> to vector<32x256xf32>
    %5 = arith.truncf %4 : vector<32x256xf32> to vector<32x256xbf16>
    %6 = vector.extract_strided_slice %3 {offsets = [0, 256], sizes = [32, 256], strides = [1, 1]} : vector<32x512xf32> to vector<32x256xf32>
    %c0_3 = arith.constant 0 : index
    %c0_4 = arith.constant 0 : index
    %7 = vector.load %arg3[%c0_3, %c0_4] : memref<1x256xf32, #tpu.memory_space<vmem>>, vector<1x256xf32>
    %8 = vector.broadcast %7 : vector<1x256xf32> to vector<32x256xf32>
    %9 = arith.addf %6, %8 : vector<32x256xf32>
    %cst_5 = arith.constant 0.000000e+00 : f32
    %10 = vector.broadcast %cst_5 : f32 to vector<32x256xf32>
    %11 = arith.maximumf %9, %10 : vector<32x256xf32>
    %12 = arith.truncf %11 : vector<32x256xf32> to vector<32x256xbf16>
    %c0_6 = arith.constant 0 : index
    %c0_7 = arith.constant 0 : index
    %13 = vector.load %arg4[%c0_6, %c0_7] : memref<256x256xbf16, #tpu.memory_space<vmem>>, vector<256x256xbf16>
    %cst_8 = arith.constant dense<0.000000e+00> : vector<32x256xf32>
    %14 = tpu.matmul %12, %13, %cst_8 {dimension_numbers = #tpu.dot_dimension_numbers<[1], [0], [0], [1], [0, 0, 1, 1], [], []>} : vector<32x256xbf16>, vector<256x256xbf16>, vector<32x256xf32> -> vector<32x256xf32>
    %c0_9 = arith.constant 0 : index
    %c0_10 = arith.constant 0 : index
    %15 = vector.load %arg5[%c0_9, %c0_10] : memref<1x256xf32, #tpu.memory_space<vmem>>, vector<1x256xf32>
    %16 = vector.broadcast %15 : vector<1x256xf32> to vector<32x256xf32>
    %17 = arith.addf %14, %16 : vector<32x256xf32>
    %18 = arith.negf %17 : vector<32x256xf32>
    %19 = math.exp %18 : vector<32x256xf32>
    %cst_11 = arith.constant 1.000000e+00 : f32
    %20 = vector.broadcast %cst_11 : f32 to vector<32x256xf32>
    %21 = arith.addf %20, %19 : vector<32x256xf32>
    %22 = arith.divf %20, %21 : vector<32x256xf32>
    %23 = arith.extf %5 : vector<32x256xbf16> to vector<32x256xf32>
    %24 = arith.mulf %22, %23 : vector<32x256xf32>
    %25 = arith.truncf %24 : vector<32x256xf32> to vector<32x256xbf16>
    %c0_12 = arith.constant 0 : index
    %c0_13 = arith.constant 0 : index
    %26 = vector.load %arg6[%c0_12, %c0_13] : memref<256x128xbf16, #tpu.memory_space<vmem>>, vector<256x128xbf16>
    %cst_14 = arith.constant dense<0.000000e+00> : vector<32x128xf32>
    %27 = tpu.matmul %25, %26, %cst_14 {dimension_numbers = #tpu.dot_dimension_numbers<[1], [0], [0], [1], [0, 0, 1, 1], [], []>} : vector<32x256xbf16>, vector<256x128xbf16>, vector<32x128xf32> -> vector<32x128xf32>
    %28 = arith.truncf %27 : vector<32x128xf32> to vector<32x128xbf16>
    %c0_15 = arith.constant 0 : index
    %c0_16 = arith.constant 0 : index
    %29 = vector.load %arg7[%c0_15, %c0_16] : memref<32x128xbf16, #tpu.memory_space<vmem>>, vector<32x128xbf16>
    tpu.vector_store %arg7[%c0_15, %c0_16], %28 {strides = array<i32>} : memref<32x128xbf16, #tpu.memory_space<vmem>>, vector<32x128xbf16>,
    return
  }
  func.func @transform_0(%arg0: i32) -> (i32, i32) {
    %c0_i32 = arith.constant 0 : i32
    %c0_i32_0 = arith.constant 0 : i32
    return %arg0, %c0_i32 : i32, i32
  }
  func.func @transform_1(%arg0: i32) -> (i32, i32) {
    %c0_i32 = arith.constant 0 : i32
    %c0_i32_0 = arith.constant 0 : i32
    %c0_i32_1 = arith.constant 0 : i32
    return %c0_i32, %c0_i32_0 : i32, i32
  }
  func.func @transform_2(%arg0: i32) -> (i32, i32) {
    %c0_i32 = arith.constant 0 : i32
    %c0_i32_0 = arith.constant 0 : i32
    %c0_i32_1 = arith.constant 0 : i32
    return %c0_i32, %c0_i32_0 : i32, i32
  }
  func.func @transform_3(%arg0: i32) -> (i32, i32) {
    %c0_i32 = arith.constant 0 : i32
    %c0_i32_0 = arith.constant 0 : i32
    %c0_i32_1 = arith.constant 0 : i32
    return %c0_i32, %c0_i32_0 : i32, i32
  }
  func.func @transform_4(%arg0: i32) -> (i32, i32) {
    %c0_i32 = arith.constant 0 : i32
    %c0_i32_0 = arith.constant 0 : i32
    %c0_i32_1 = arith.constant 0 : i32
    return %c0_i32, %c0_i32_0 : i32, i32
  }
  func.func @transform_5(%arg0: i32) -> (i32, i32) {
    %c0_i32 = arith.constant 0 : i32
    %c0_i32_0 = arith.constant 0 : i32
    %c0_i32_1 = arith.constant 0 : i32
    return %c0_i32, %c0_i32_0 : i32, i32
  }
  func.func @transform_6(%arg0: i32) -> (i32, i32) {
    %c0_i32 = arith.constant 0 : i32
    %c0_i32_0 = arith.constant 0 : i32
    return %arg0, %c0_i32 : i32, i32
  }
}

</mosaic_0001>

<bundles_post_ra>
// kernel: tile.13
= control target key start
LH: loop header
LB: loop body
LE: loop exit
PB: predicated region body
PF: predicated region fallthrough
CT: control target
= control target key end

     0   :  { %s22_s0 = inlined_call_operand.vmem [shape: f32[32], index: 0, kind: input, shape index: {}]   ;;  %s23_s1 = inlined_call_operand.vmem [shape: f32[8,32], index: 1, kind: output, shape index: {}]  }
   0x1   :  { %v4_v0 = vld [vmem:[%s22_s0] ss:$0 sm:$0xff] }
   0x2   :  { %5 = vst [vmem:[%s23_s1] sm:$0xff] %v4_v0 }

// kernel: tile.14
= control target key start
LH: loop header
LB: loop body
LE: loop exit
PB: predicated region body
PF: predicated region fallthrough
CT: control target
= control target key end

     0   :  { %s7_s6 = smov 3  ;;  %s14_s9 = smov 3  ;;  %vm4_vm0 = vcmask 261120   ;;  %vm11_vm1 = vcmask 1048320   ;;  %vm18_vm2 = vcmask 785920   ;;  %vm25_vm3 = vcmask 523520   ;;  %s79_s0 = inlined_call_operand.vmem [shape: f32[8,32], index: 0, kind: input, shape index: {}]   ;;  %s80_s1 = inlined_call_operand.vmem [shape: f32[1,256], index: 1, kind: output, shape index: {}]  }
   0x1   :  { %v41_v0 = vld [vmem:[%s79_s0 + $0x3] ss:$4 sm:%s7_s6]   ;;  %s48_s10 = smov 96   ;;  %s21_s11 = smov 3  ;;  %v42_v1 = vld [vmem:[%s79_s0 + $0x2] ss:$4 sm:%s14_s9]  }
   0x2   :  { %9 = vrot.lane.b32.xlu0 %v41_v0, %s48_s10  ;;  %v43_v2 = vld [vmem:[%s79_s0 + $0x1] ss:$4 sm:%s21_s11]   ;;  %s2_s16 = smov 3  ;;  %s49_s17 = smov 32  }
   0x3   :  { %23 = vrot.lane.b32.xlu1 %v43_v2, %s49_s17  ;;  %v3_v3 = vld [vmem:[%s79_s0] ss:$4 sm:%s2_s16]   ;;  %s50_s0 = smov 64  }
   0x4   :  { %5 = vst.msk [vmem:[#allocation0] ss:$8 sm:$0x3] %vm4_vm0, %v3_v3  }
   0x6   :  { %16 = vrot.lane.b32.xlu0 %v42_v1, %s50_s0 }
  0x74   :  { %v10_v4 = vpop.permute.xlu0 %9  }
  0x75   :  { %12 = vst.msk [vmem:[#allocation0] ss:$8 sm:$0x3] %vm11_vm1, %v10_v4   ;;  %v24_v5 = vpop.permute.xlu1 %23  }
  0x78   :  { %v17_v6 = vpop.permute.xlu0 %16  }
  0x79   :  { %19 = vst.msk [vmem:[#allocation0] ss:$8 sm:$0x3] %vm18_vm2, %v17_v6  }
  0x7a   :  { %26 = vst.msk [vmem:[#allocation0] ss:$8 sm:$0x3] %vm25_vm3, %v24_v5  }
  0x81   :  { %v31_v7 = vld [vmem:[#allocation0] sm:$0x1]  ;;  %v36_v8 = vld [vmem:[#allocation0 + $0x8] sm:$0x1] }
  0x82   :  { %34 = vst [vmem:[%s80_s1] sm:$0x1] %v31_v7  ;;  %44 = vst [vmem:[%s80_s1 + $0x1] sm:$0x1] %v36_v8 }

// kernel: emd_mvdr_forward.1
= control target key start
LH: loop header
LB: loop body
LE: loop exit
PB: predicated region body
PF: predicated region fallthrough
CT: control target
= control target key end

     0   :  { %s1517_s21 = smov 0   ;;  %s1824_s0 = inlined_call_operand.vmem [shape: f32[64,128], index: 0, kind: input, shape index: {}]   ;;  %s1825_s1 = inlined_call_operand.vmem [shape: bf16[128,512], index: 1, kind: input, shape index: {}]   ;;  %s1826_s2 = inlined_call_operand.vmem [shape: f32[1,256], index: 2, kind: input, shape index: {}]   ;;  %s1827_s3 = inlined_call_operand.vmem [shape: bf16[256,256], index: 3, kind: input, shape index: {}]   ;;  %s1828_s4 = inlined_call_operand.vmem [shape: f32[1,256], index: 4, kind: input, shape index: {}]   ;;  %s1829_s5 = inlined_call_operand.vmem [shape: bf16[256,128], index: 5, kind: input, shape index: {}]   ;;  %s1830_s6 = inlined_call_operand.vmem [shape: bf16[64,128], index: 6, kind: output, shape index: {}]  }
   0x1 LB: > { %s1174_s22 = sadd.s32 4294967295, %s1479_s21   ;;  %p1178_p0 = scmp.ge.s32.totalorder %s1479_s21, 1  ;;  %s1479_s21 = sphi %s1517_s21, %s16_s21  }
   0x2   : > { %p213_p1 = scmp.lt.s32.totalorder %s1479_s21, 3 }
   0x4   : > { %p214_p2 = pnand %p1178_p0, %p213_p1 }
   0x5   : > { %s1179_s13 = sshll.u32 (!%p214_p2), %s1174_s22, 2 }
   0x6   : > { %217 = sbr.rel (%p214_p2) target bundleno = 701 (0x2bd), region = 44  ;;  %p244_p3 = scmp.lt.s32.totalorder (!%p214_p2), %s1179_s13, 7 }
   0xb   : > { %v1329_v0 = vld [vmem:[%s1825_s1 + $0xec] ss:$16 sps:$4 sm:$0xff]   ;;  %v1331_v1 = vld [vmem:[%s1825_s1 + $0xe8] ss:$16 sps:$4 sm:$0xff]   ;;  %v1481_v2 = vmov 0   ;;  %s1832_s13 = smov (!%p244_p3, %s1179_s13), 7 }
   0xc   : > { %539 = vmatprep.mubr.bf16.mxu1 %v1481_v2  ;;  %486 = vmatprep.mubr.bf16.mxu0 %v1481_v2  ;;  %v1332_v3 = vld [vmem:[%s1825_s1 + $0xcc] ss:$16 sps:$4 sm:$0xff]   ;;  %v1334_v4 = vld [vmem:[%s1825_s1 + $0xc8] ss:$16 sps:$4 sm:$0xff]   ;;  %v1353_v10 = vld [vmem:[%s1825_s1 + $0xe4] ss:$16 sps:$4 sm:$0xff]  }
   0xd   : > { %507 = vmatprep.subr.bf16.mxu1 %v1329_v0  ;;  %v1335_v5 = vld [vmem:[%s1825_s1 + $0xac] ss:$16 sps:$4 sm:$0xff]   ;;  %v1337_v6 = vld [vmem:[%s1825_s1 + $0xa8] ss:$16 sps:$4 sm:$0xff]   ;;  %v1355_v11 = vld [vmem:[%s1825_s1 + $0xe0] ss:$16 sps:$4 sm:$0xff]   ;;  %454 = vmatprep.subr.bf16.mxu0 %v1353_v10 }
   0xe   : > { %508 = vmatpush1.bf16.msra.mxu1 %v1331_v1  ;;  %v1338_v7 = vld [vmem:[%s1825_s1 + $0x8c] ss:$16 sps:$4 sm:$0xff]   ;;  %v1340_v8 = vld [vmem:[%s1825_s1 + $0x88] ss:$16 sps:$4 sm:$0xff]   ;;  %v1356_v13 = vld [vmem:[%s1825_s1 + $0xc4] ss:$16 sps:$4 sm:$0xff]   ;;  %455 = vmatpush1.bf16.msra.mxu0 %v1355_v11 }
   0xf   : > { %509 = vmatprep.subr.bf16.mxu1 %v1332_v3  ;;  %v1341_v9 = vld [vmem:[%s1825_s1 + $0x6c] ss:$16 sps:$4 sm:$0xff]   ;;  %v1343_v12 = vld [vmem:[%s1825_s1 + $0x68] ss:$16 sps:$4 sm:$0xff]   ;;  %v1358_v15 = vld [vmem:[%s1825_s1 + $0xc0] ss:$16 sps:$4 sm:$0xff]   ;;  %456 = vmatprep.subr.bf16.mxu0 %v1356_v13 }
  0x10   : > { %v1344_v14 = vld [vmem:[%s1825_s1 + $0x4c] ss:$16 sps:$4 sm:$0xff]   ;;  %v1359_v16 = vld [vmem:[%s1825_s1 + $0xa4] ss:$16 sps:$4 sm:$0xff]   ;;  %v1346_v17 = vld [vmem:[%s1825_s1 + $0x48] ss:$16 sps:$4 sm:$0xff]  }
  0x11   : > { %v1347_v18 = vld [vmem:[%s1825_s1 + $0x2c] ss:$16 sps:$4 sm:$0xff]   ;;  %v1361_v19 = vld [vmem:[%s1825_s1 + $0xa0] ss:$16 sps:$4 sm:$0xff]   ;;  %s1180_s16 = sshll.u32 %s1832_s13, 3  ;;  %s1182_s14 = sshll.u32 %s1832_s13, 2 }
  0x12   : > { %510 = vmatpush1.bf16.msra.mxu1 %v1334_v4  ;;  %457 = vmatpush1.bf16.msra.mxu0 %v1358_v15  ;;  %v1362_v20 = vld [vmem:[%s1825_s1 + $0x84] ss:$16 sps:$4 sm:$0xff]   ;;  %v1349_v21 = vld [vmem:[%s1825_s1 + $0x28] ss:$16 sps:$4 sm:$0xff]   ;;  %v1350_v22 = vld [vmem:[%s1825_s1 + $0xc] ss:$16 sps:$4 sm:$0xff]   ;;  %s247_s26 = scalar_lea.vmem %s1824_s0, %s1180_s16  ;;  %s253_s17 = scalar_lea.vmem %s1830_s6, %s1182_s14 }
  0x13   : > { %511 = vmatprep.subr.bf16.mxu1 %v1335_v5  ;;  %458 = vmatprep.subr.bf16.mxu0 %v1359_v16  ;;  %v1364_v23 = vld [vmem:[%s1825_s1 + $0x80] ss:$16 sps:$4 sm:$0xff]   ;;  %v1365_v24 = vld [vmem:[%s1825_s1 + $0x64] ss:$16 sps:$4 sm:$0xff]   ;;  %v1352_v25 = vld [vmem:[%s1825_s1 + $0x8] ss:$16 sps:$4 sm:$0xff]  }
  0x14   : > { %v256_v26 = vld [vmem:[%s247_s26] sm:$0xff]  ;;  %v257_v27 = vld [vmem:[%s247_s26 + $0x8] sm:$0xff]  ;;  %v258_v33 = vld [vmem:[%s247_s26 + $0x10] sm:$0xff] }
  0x15   : > { %v1367_v28 = vld [vmem:[%s1825_s1 + $0x60] ss:$16 sps:$4 sm:$0xff]   ;;  %v1368_v29 = vld [vmem:[%s1825_s1 + $0x44] ss:$16 sps:$4 sm:$0xff]   ;;  %v260_v30 = vpack.c.bf16 %v257_v27, %v256_v26  ;;  %v259_v34 = vld [vmem:[%s247_s26 + $0x18] sm:$0xff] }
  0x16   : > { %512 = vmatpush1.bf16.msra.mxu1 %v1337_v6  ;;  %459 = vmatpush1.bf16.msra.mxu0 %v1361_v19  ;;  %v1370_v31 = vld [vmem:[%s1825_s1 + $0x40] ss:$16 sps:$4 sm:$0xff]   ;;  %v1371_v32 = vld [vmem:[%s1825_s1 + $0x24] ss:$16 sps:$4 sm:$0xff]   ;;  %v261_v37 = vpack.c.bf16 %v259_v34, %v258_v33 }
  0x17   : > { %513 = vmatprep.subr.bf16.mxu1 %v1338_v7  ;;  %460 = vmatprep.subr.bf16.mxu0 %v1362_v20  ;;  %v1373_v35 = vld [vmem:[%s1825_s1 + $0x20] ss:$16 sps:$4 sm:$0xff]   ;;  %v1374_v36 = vld [vmem:[%s1825_s1 + $0x4] ss:$16 sps:$4 sm:$0xff]   ;;  %v566_v7 = vlaneseq }
  0x18   : > { %v1376_v38 = vld [vmem:[%s1825_s1] ss:$16 sps:$4 sm:$0xff]   ;;  %v1379_v39 = vld [vmem:[%s1827_s3 + $0x74] ss:$8 sps:$4 sm:$0xff]   ;;  %v1382_v41 = vld [vmem:[%s1827_s3 + $0x64] ss:$8 sps:$4 sm:$0xff]  }
  0x19   : > { %v1377_v40 = vld [vmem:[%s1827_s3 + $0x70] ss:$8 sps:$4 sm:$0xff]   ;;  %v1380_v42 = vld [vmem:[%s1827_s3 + $0x60] ss:$8 sps:$4 sm:$0xff]   ;;  %v1385_v43 = vld [vmem:[%s1827_s3 + $0x54] ss:$8 sps:$4 sm:$0xff]  }
  0x1a   : > { %514 = vmatpush1.bf16.msra.mxu1 %v1340_v8  ;;  %461 = vmatpush1.bf16.msra.mxu0 %v1364_v23  ;;  %v1383_v44 = vld [vmem:[%s1827_s3 + $0x50] ss:$8 sps:$4 sm:$0xff]   ;;  %v1388_v45 = vld [vmem:[%s1827_s3 + $0x44] ss:$8 sps:$4 sm:$0xff]   ;;  %v1386_v46 = vld [vmem:[%s1827_s3 + $0x40] ss:$8 sps:$4 sm:$0xff]  }
  0x1b   : > { %515 = vmatprep.subr.bf16.mxu1 %v1341_v9  ;;  %462 = vmatprep.subr.bf16.mxu0 %v1365_v24  ;;  %v1391_v47 = vld [vmem:[%s1827_s3 + $0x34] ss:$8 sps:$4 sm:$0xff]   ;;  %v1389_v48 = vld [vmem:[%s1827_s3 + $0x30] ss:$8 sps:$4 sm:$0xff]   ;;  %v1394_v49 = vld [vmem:[%s1827_s3 + $0x24] ss:$8 sps:$4 sm:$0xff]  }
  0x1c   : > { %v1392_v50 = vld [vmem:[%s1827_s3 + $0x20] ss:$8 sps:$4 sm:$0xff]   ;;  %v1397_v51 = vld [vmem:[%s1827_s3 + $0x14] ss:$8 sps:$4 sm:$0xff]   ;;  %v1395_v52 = vld [vmem:[%s1827_s3 + $0x10] ss:$8 sps:$4 sm:$0xff]  }
  0x1d   : > { %v1400_v53 = vld [vmem:[%s1827_s3 + $0x4] ss:$8 sps:$4 sm:$0xff]   ;;  %v1398_v54 = vld [vmem:[%s1827_s3] ss:$8 sps:$4 sm:$0xff]   ;;  %v1403_v55 = vld [vmem:[%s1827_s3 + $0xf4] ss:$8 sps:$4 sm:$0xff]  }
  0x1e   : > { %516 = vmatpush1.bf16.msra.mxu1 %v1343_v12  ;;  %463 = vmatpush1.bf16.msra.mxu0 %v1367_v28  ;;  %v1401_v56 = vld [vmem:[%s1827_s3 + $0xf0] ss:$8 sps:$4 sm:$0xff]   ;;  %v1406_v57 = vld [vmem:[%s1827_s3 + $0xe4] ss:$8 sps:$4 sm:$0xff]   ;;  %v1404_v58 = vld [vmem:[%s1827_s3 + $0xe0] ss:$8 sps:$4 sm:$0xff]  }
  0x1f   : > { %517 = vmatprep.subr.bf16.mxu1 %v1344_v14  ;;  %464 = vmatprep.subr.bf16.mxu0 %v1368_v29  ;;  %v1409_v59 = vld [vmem:[%s1827_s3 + $0xd4] ss:$8 sps:$4 sm:$0xff]   ;;  %v1407_v60 = vld [vmem:[%s1827_s3 + $0xd0] ss:$8 sps:$4 sm:$0xff]   ;;  %v1412_v61 = vld [vmem:[%s1827_s3 + $0xc4] ss:$8 sps:$4 sm:$0xff]  }
  0x20   : > { %v1410_v62 = vld [vmem:[%s1827_s3 + $0xc0] ss:$8 sps:$4 sm:$0xff]   ;;  %v1415_v63 = vld [vmem:[%s1827_s3 + $0xb4] ss:$8 sps:$4 sm:$0xff]   ;;  %v1413_v0 = vld [vmem:[%s1827_s3 + $0xb0] ss:$8 sps:$4 sm:$0xff]  }
  0x21   : > { %v1418_v1 = vld [vmem:[%s1827_s3 + $0xa4] ss:$8 sps:$4 sm:$0xff]   ;;  %v1421_v3 = vld [vmem:[%s1827_s3 + $0x94] ss:$8 sps:$4 sm:$0xff]   ;;  %v1419_v4 = vld [vmem:[%s1827_s3 + $0x90] ss:$8 sps:$4 sm:$0xff]  }
  0x22   : > { %518 = vmatpush1.bf16.msra.mxu1 %v1346_v17  ;;  %465 = vmatpush1.bf16.msra.mxu0 %v1370_v31  ;;  %v1424_v5 = vld [vmem:[%s1827_s3 + $0x84] ss:$8 sps:$4 sm:$0xff]   ;;  %v1422_v6 = vld [vmem:[%s1827_s3 + $0x80] ss:$8 sps:$4 sm:$0xff]   ;;  %v1727_v8 = vshrl.u32 %v566_v7, 7 }
  0x23   : > { %519 = vmatprep.subr.bf16.mxu1 %v1347_v18  ;;  %466 = vmatprep.subr.bf16.mxu0 %v1371_v32  ;;  %v564_v11 = vld [vmem:[%s1826_s2] sm:$0x3] }
  0x24   : > { %v572_v9 = vsub.s32 1, %v1727_v8  ;;  %v568_v10 = vsub.s32 0, %v1727_v8 }
  0x26   : > { %520 = vmatpush1.bf16.msra.mxu1 %v1349_v21  ;;  %467 = vmatpush1.bf16.msra.mxu0 %v1373_v35  ;;  %v573_v13 = vrot.slane %v564_v11, %v572_v9  ;;  %v569_v14 = vrot.slane %v564_v11, %v568_v10 }
  0x27   : > { %521 = vmatprep.subr.bf16.mxu1 %v1350_v22  ;;  %468 = vmatprep.subr.bf16.mxu0 %v1374_v36 }
  0x2a   : > { %522 = vmatpush1.bf16.msra.mxu1 %v1352_v25  ;;  %469 = vmatpush1.bf16.msra.mxu0 %v1376_v38 }
  0x2b   : > { %800 = vmatprep.subr.bf16.mxu0 %v1379_v39 }
  0x2d   : > { %540 = vmatmul.mubr.bf16.vlgmr.msra.gmra.mxu1 %v260_v30  ;;  %487 = vmatmul.mubr.bf16.vlgmr.msra.gmra.mxu0 %v260_v30 }
  0x2e   : > { %549 = vmatprep.mubr.bf16.mxu1 %v1481_v2  ;;  %801 = vmatpush1.bf16.msra.mxu0 %v1377_v40 }
  0x2f   : > { %496 = vmatprep.mubr.bf16.mxu0 %v1481_v2  ;;  %802 = vmatprep.subr.bf16.mxu0 %v1382_v41  ;;  %v1416_v2 = vld [vmem:[%s1827_s3 + $0xa0] ss:$8 sps:$4 sm:$0xff]  }
  0x32   : > { %803 = vmatpush1.bf16.msra.mxu0 %v1380_v42  ;;  %v1425_v42 = vld [vmem:[%s1829_s5 + $0x78] sm:$0xff]  }
  0x33   : > { %804 = vmatprep.subr.bf16.mxu0 %v1385_v43  ;;  %v1426_v43 = vld [vmem:[%s1829_s5 + $0x38] sm:$0xff]   ;;  %1292 = vmatprep.subr.bf16.mxu1 %v1425_v42 }
  0x34   : > { %1293 = vmatpush3.bf16.msra.mxu1 %v1426_v43 }
  0x35   : > { %550 = vmatmul.mubr.bf16.gmra.mxu1 %v261_v37  ;;  %497 = vmatmul.mubr.bf16.gmra.mxu0 %v261_v37 }
  0x36   : > { %805 = vmatpush1.bf16.msra.mxu0 %v1383_v44  ;;  %v1427_v44 = vld [vmem:[%s1829_s5 + $0x70] sm:$0xff]  }
  0x37   : > { %806 = vmatprep.subr.bf16.mxu0 %v1388_v45  ;;  %v1428_v45 = vld [vmem:[%s1829_s5 + $0x30] sm:$0xff]   ;;  %1294 = vmatprep.subr.bf16.mxu1 %v1427_v44 }
  0x38   : > { %1295 = vmatpush3.bf16.msra.mxu1 %v1428_v45 }
  0x3a   : > { %807 = vmatpush1.bf16.msra.mxu0 %v1386_v46  ;;  %v1429_v46 = vld [vmem:[%s1829_s5 + $0x68] sm:$0xff]  }
  0x3b   : > { %808 = vmatprep.subr.bf16.mxu0 %v1391_v47  ;;  %v1430_v47 = vld [vmem:[%s1829_s5 + $0x28] sm:$0xff]   ;;  %1296 = vmatprep.subr.bf16.mxu1 %v1429_v46 }
  0x3c   : > { %1297 = vmatpush3.bf16.msra.mxu1 %v1430_v47 }
  0x3e   : > { %809 = vmatpush1.bf16.msra.mxu0 %v1389_v48  ;;  %v1431_v48 = vld [vmem:[%s1829_s5 + $0x60] sm:$0xff]  }
  0x3f   : > { %810 = vmatprep.subr.bf16.mxu0 %v1394_v49  ;;  %v1432_v49 = vld [vmem:[%s1829_s5 + $0x20] sm:$0xff]   ;;  %1298 = vmatprep.subr.bf16.mxu1 %v1431_v48 }
  0x40   : > { %1299 = vmatpush3.bf16.msra.mxu1 %v1432_v49 }
  0x42   : > { %811 = vmatpush1.bf16.msra.mxu0 %v1392_v50  ;;  %v1433_v50 = vld [vmem:[%s1829_s5 + $0x58] sm:$0xff]  }
  0x43   : > { %812 = vmatprep.subr.bf16.mxu0 %v1397_v51  ;;  %v1434_v51 = vld [vmem:[%s1829_s5 + $0x18] sm:$0xff]   ;;  %1300 = vmatprep.subr.bf16.mxu1 %v1433_v50 }
  0x44   : > { %1301 = vmatpush3.bf16.msra.mxu1 %v1434_v51 }
  0x46   : > { %813 = vmatpush1.bf16.msra.mxu0 %v1395_v52  ;;  %v1435_v52 = vld [vmem:[%s1829_s5 + $0x50] sm:$0xff]  }
  0x47   : > { %814 = vmatprep.subr.bf16.mxu0 %v1400_v53  ;;  %v1436_v53 = vld [vmem:[%s1829_s5 + $0x10] sm:$0xff]   ;;  %1302 = vmatprep.subr.bf16.mxu1 %v1435_v52 }
  0x48   : > { %1303 = vmatpush3.bf16.msra.mxu1 %v1436_v53 }
  0x4a   : > { %815 = vmatpush1.bf16.msra.mxu0 %v1398_v54  ;;  %v1437_v54 = vld [vmem:[%s1829_s5 + $0x48] sm:$0xff]  }
  0x4b   : > { %816 = vmatprep.subr.bf16.mxu0 %v1403_v55  ;;  %v1438_v55 = vld [vmem:[%s1829_s5 + $0x8] sm:$0xff]   ;;  %1304 = vmatprep.subr.bf16.mxu1 %v1437_v54 }
  0x4c   : > { %1305 = vmatpush3.bf16.msra.mxu1 %v1438_v55 }
  0x4e   : > { %817 = vmatpush2.bf16.msra.mxu0 %v1401_v56  ;;  %v1439_v56 = vld [vmem:[%s1829_s5 + $0x40] sm:$0xff]  }
  0x4f   : > { %818 = vmatprep.subr.bf16.mxu0 %v1406_v57  ;;  %v1440_v57 = vld [vmem:[%s1829_s5] sm:$0xff]   ;;  %1306 = vmatprep.subr.bf16.mxu1 %v1439_v56 }
  0x50   : > { %1307 = vmatpush3.bf16.msra.mxu1 %v1440_v57 }
  0x52   : > { %819 = vmatpush2.bf16.msra.mxu0 %v1404_v58 }
  0x53   : > { %820 = vmatprep.subr.bf16.mxu0 %v1409_v59 }
  0x56   : > { %821 = vmatpush2.bf16.msra.mxu0 %v1407_v60 }
  0x57   : > { %822 = vmatprep.subr.bf16.mxu0 %v1412_v61 }
  0x5a   : > { %823 = vmatpush2.bf16.msra.mxu0 %v1410_v62 }
  0x5b   : > { %824 = vmatprep.subr.bf16.mxu0 %v1415_v63 }
  0x5e   : > { %825 = vmatpush2.bf16.msra.mxu0 %v1413_v0 }
  0x5f   : > { %826 = vmatprep.subr.bf16.mxu0 %v1418_v1  ;;  %v628_v1 = vld [vmem:[%s1828_s4] sm:$0x3] }
  0x62   : > { %827 = vmatpush2.bf16.msra.mxu0 %v1416_v2  ;;  %v633_v2 = vrot.slane %v628_v1, %v568_v10 }
  0x63   : > { %828 = vmatprep.subr.bf16.mxu0 %v1421_v3 }
  0x66   : > { %829 = vmatpush2.bf16.msra.mxu0 %v1419_v4  ;;  %v637_v4 = vrot.slane %v628_v1, %v572_v9 }
  0x67   : > { %830 = vmatprep.subr.bf16.mxu0 %v1424_v5 }
  0x6a   : > { %831 = vmatpush2.bf16.msra.mxu0 %v1422_v6 }
  0xed   : > { %v541_v12 = vpop.f32.mrf.mxu1  ;;  %v1786_v58 = vpop.f32.mrf.mxu0 }
  0xee   : > { %v576_v19 = vadd.f32 %v569_v14, %v541_v12 }
  0xef   : > { %v543_v15 = vpop.f32.mrf.mxu1  ;;  %v1788_v59 = vpop.f32.mrf.mxu0 }
  0xf0   : > { %v577_v17 = vadd.f32 %v573_v13, %v543_v15  ;;  %v584_v26 = vmax.f32 %v576_v19, 0.0 }
  0xf1   : > { %v545_v16 = vpop.f32.mrf.mxu1  ;;  %v1790_v60 = vpop.f32.mrf.mxu0 }
  0xf2   : > { %v578_v18 = vadd.f32 %v569_v14, %v545_v16  ;;  %v585_v24 = vmax.f32 %v577_v17, 0.0  ;;  %v560_v45 = vpack.c.bf16 %v1790_v60, %v1786_v58 }
  0xf3   : > { %v547_v20 = vpop.f32.mrf.mxu1  ;;  %v1792_v61 = vpop.f32.mrf.mxu0 }
  0xf4   : > { %v579_v21 = vadd.f32 %v573_v13, %v547_v20  ;;  %v586_v22 = vmax.f32 %v578_v18, 0.0  ;;  %v561_v46 = vpack.c.bf16 %v1792_v61, %v1788_v59  ;;  %v903_v49 = vunpack.c.h.bf16 %v560_v45 }
  0xf5   : > { %v551_v23 = vpop.f32.mrf.mxu1  ;;  %v1794_v62 = vpop.f32.mrf.mxu0  ;;  %v901_v54 = vunpack.c.l.bf16 %v560_v45 }
  0xf6   : > { %v587_v25 = vmax.f32 %v579_v21, 0.0  ;;  %v592_v29 = vpack.c.bf16 %v586_v22, %v584_v26  ;;  %v580_v33 = vadd.f32 %v569_v14, %v551_v23  ;;  %v902_v51 = vunpack.c.l.bf16 %v561_v46 }
  0xf7   : > { %v553_v27 = vpop.f32.mrf.mxu1  ;;  %v1796_v63 = vpop.f32.mrf.mxu0  ;;  %v904_v52 = vunpack.c.h.bf16 %v561_v46 }
  0xf8   : > { %v593_v28 = vpack.c.bf16 %v587_v25, %v585_v24  ;;  %v581_v31 = vadd.f32 %v573_v13, %v553_v27  ;;  %v588_v39 = vmax.f32 %v580_v33, 0.0 }
  0xf9   : > { %v555_v30 = vpop.f32.mrf.mxu1  ;;  %v1798_v0 = vpop.f32.mrf.mxu0 }
  0xfa   : > { %v582_v32 = vadd.f32 %v569_v14, %v555_v30  ;;  %832 = vmatprep.mubr.bf16.mxu0 %v593_v28  ;;  %v589_v37 = vmax.f32 %v581_v31, 0.0  ;;  %v562_v1 = vpack.c.bf16 %v1798_v0, %v1794_v62 }
  0xfb   : > { %v557_v34 = vpop.f32.mrf.mxu1  ;;  %833 = vmatmul.mubr.bf16.vlgmr.msra.gmra.mxu0 %v592_v29  ;;  %v1805_v3 = vpop.f32.mrf.mxu0 }
  0xfc   : > { %v583_v35 = vadd.f32 %v573_v13, %v557_v34  ;;  %v590_v36 = vmax.f32 %v582_v32, 0.0  ;;  %v563_v60 = vpack.c.bf16 %v1805_v3, %v1796_v63 }
  0xfe   : > { %v591_v38 = vmax.f32 %v583_v35, 0.0  ;;  %v594_v41 = vpack.c.bf16 %v590_v36, %v588_v39 }
 0x100   : > { %v595_v40 = vpack.c.bf16 %v591_v38, %v589_v37 }
 0x102   : > { %842 = vmatprep.mubr.bf16.mxu0 %v595_v40 }
 0x103   : > { %843 = vmatmul.mubr.bf16.gmra.mxu0 %v594_v41 }
 0x1bb   : > { %v834_v5 = vpop.f32.mrf.mxu0 }
 0x1bc   : > { %v835_v6 = vadd.f32 %v834_v5, %v633_v2  ;;  %v907_v5 = vunpack.c.h.bf16 %v562_v1 }
 0x1bd   : > { %v836_v7 = vpop.f32.mrf.mxu0 }
 0x1be   : > { %v1247_v11 = vmul.f32 -1.442695, %v835_v6  ;;  %v837_v12 = vadd.f32 %v836_v7, %v637_v4  ;;  %v906_v7 = vunpack.c.l.bf16 %v563_v60 }
 0x1bf   : > { %v838_v13 = vpop.f32.mrf.mxu0 }
 0x1c0   : > { %v1248_v14 = vmul.f32 -1.442695, %v837_v12  ;;  %v839_v15 = vadd.f32 %v838_v13, %v633_v2  ;;  %1441 = vpow2.f32 %v1247_v11  ;;  %v908_v11 = vunpack.c.h.bf16 %v563_v60 }
 0x1c1   : > { %v840_v16 = vpop.f32.mrf.mxu0  ;;  %v905_v13 = vunpack.c.l.bf16 %v562_v1 }
 0x1c2   : > { %1443 = vpow2.f32 %v1248_v14  ;;  %v1249_v17 = vmul.f32 -1.442695, %v839_v15  ;;  %v841_v18 = vadd.f32 %v840_v16, %v637_v4 }
 0x1c3   : > { %v844_v19 = vpop.f32.mrf.mxu0 }
 0x1c4   : > { %1445 = vpow2.f32 %v1249_v17  ;;  %v1250_v10 = vmul.f32 -1.442695, %v841_v18  ;;  %v845_v20 = vadd.f32 %v844_v19, %v633_v2 }
 0x1c5   : > { %v846_v21 = vpop.f32.mrf.mxu0 }
 0x1c6   : > { %1447 = vpow2.f32 %v1250_v10  ;;  %v1251_v8 = vmul.f32 -1.442695, %v845_v20  ;;  %v847_v9 = vadd.f32 %v846_v21, %v637_v4 }
 0x1c7   : > { %v848_v22 = vpop.f32.mrf.mxu0 }
 0x1c8   : > { %v1252_v23 = vmul.f32 -1.442695, %v847_v9  ;;  %v849_v24 = vadd.f32 %v848_v22, %v633_v2  ;;  %1449 = vpow2.f32 %v1251_v8 }
 0x1c9   : > { %v850_v25 = vpop.f32.mrf.mxu0 }
 0x1ca   : > { %1451 = vpow2.f32 %v1252_v23  ;;  %v1253_v26 = vmul.f32 -1.442695, %v849_v24  ;;  %v851_v27 = vadd.f32 %v850_v25, %v637_v4 }
 0x1cc   : > { %1453 = vpow2.f32 %v1253_v26  ;;  %v1254_v28 = vmul.f32 -1.442695, %v851_v27 }
 0x1cd   : > { %v1442_v29 = vpop.eup %1441 }
 0x1ce   : > { %1455 = vpow2.f32 %v1254_v28  ;;  %v877_v33 = vadd.f32 1.0, %v1442_v29 }
 0x1cf   : > { %v1444_v30 = vpop.eup %1443 }
 0x1d0   : > { %v878_v31 = vadd.f32 1.0, %v1444_v30 }
 0x1d1   : > { %v1446_v32 = vpop.eup %1445 }
 0x1d2   : > { %v879_v34 = vadd.f32 1.0, %v1446_v32  ;;  %1457 = vrcp.f32 %v878_v31 }
 0x1d3   : > { %v1448_v35 = vpop.eup %1447 }
 0x1d4   : > { %1459 = vrcp.f32 %v879_v34  ;;  %v880_v36 = vadd.f32 1.0, %v1448_v35 }
 0x1d5   : > { %1461 = vrcp.f32 %v877_v33  ;;  %v1450_v37 = vpop.eup %1449 }
 0x1d6   : > { %1463 = vrcp.f32 %v880_v36  ;;  %v881_v41 = vadd.f32 1.0, %v1450_v37 }
 0x1d7   : > { %v1452_v38 = vpop.eup %1451 }
 0x1d8   : > { %v882_v39 = vadd.f32 1.0, %v1452_v38 }
 0x1d9   : > { %v1454_v40 = vpop.eup %1453 }
 0x1da   : > { %v883_v42 = vadd.f32 1.0, %v1454_v40  ;;  %1465 = vrcp.f32 %v882_v39 }
 0x1db   : > { %v1456_v43 = vpop.eup %1455 }
 0x1dc   : > { %1467 = vrcp.f32 %v883_v42  ;;  %v884_v44 = vadd.f32 1.0, %v1456_v43 }
 0x1dd   : > { %1469 = vrcp.f32 %v881_v41 }
 0x1de   : > { %1471 = vrcp.f32 %v884_v44 }
 0x1df   : > { %v1458_v47 = vpop.eup %1457 }
 0x1e0   : > { %v910_v56 = vmul.f32 %v1458_v47, %v902_v51 }
 0x1e1   : > { %v1460_v48 = vpop.eup %1459 }
 0x1e2   : > { %v1462_v50 = vpop.eup %1461  ;;  %v911_v55 = vmul.f32 %v1460_v48, %v903_v49 }
 0x1e3   : > { %v1464_v53 = vpop.eup %1463  ;;  %v909_v58 = vmul.f32 %v1462_v50, %v901_v54 }
 0x1e4   : > { %v912_v57 = vmul.f32 %v1464_v53, %v904_v52 }
 0x1e5   : > { %v917_v61 = vpack.c.bf16 %v911_v55, %v909_v58 }
 0x1e6   : > { %v918_v59 = vpack.c.bf16 %v912_v57, %v910_v56 }
 0x1e7   : > { %v1466_v2 = vpop.eup %1465 }
 0x1e8   : > { %1081 = vmatprep.mubr.bf16.mxu1 %v918_v59  ;;  %v914_v15 = vmul.f32 %v1466_v2, %v906_v7 }
 0x1e9   : > { %v1468_v4 = vpop.eup %1467  ;;  %1082 = vmatmul.mubr.bf16.vlgmr.msra.gmra.mxu1 %v917_v61 }
 0x1ea   : > { %v1470_v6 = vpop.eup %1469  ;;  %v915_v14 = vmul.f32 %v1468_v4, %v907_v5 }
 0x1eb   : > { %v1472_v12 = vpop.eup %1471  ;;  %v913_v0 = vmul.f32 %v1470_v6, %v905_v13 }
 0x1ec   : > { %v916_v62 = vmul.f32 %v1472_v12, %v908_v11 }
 0x1ed   : > { %v919_v17 = vpack.c.bf16 %v915_v14, %v913_v0 }
 0x1ee   : > { %v920_v16 = vpack.c.bf16 %v916_v62, %v914_v15 }
 0x1f0   : > { %1089 = vmatprep.mubr.bf16.mxu1 %v920_v16 }
 0x1f1   : > { %1090 = vmatmul.mubr.bf16.gmra.mxu1 %v919_v17 }
 0x2a9   : > { %v1308_v63 = vpop.f32.mrf.mxu1 }
 0x2ab   : > { %v1309_v3 = vpop.f32.mrf.mxu1 }
 0x2ac   : > { %v1310_v10 = vadd.f32 %v1309_v3, %v1308_v63 }
 0x2ad   : > { %v1311_v18 = vpop.f32.mrf.mxu1 }
 0x2af   : > { %v1312_v19 = vpop.f32.mrf.mxu1 }
 0x2b0   : > { %v1313_v20 = vadd.f32 %v1312_v19, %v1311_v18 }
 0x2b1   : > { %v1314_v21 = vpop.f32.mrf.mxu1 }
 0x2b2   : > { %v1284_v8 = vpack.c.bf16 %v1313_v20, %v1310_v10 }
 0x2b3   : > { %v1315_v9 = vpop.f32.mrf.mxu1 }
 0x2b4   : > { %1285 = vst [vmem:[%s253_s17] sm:$0xff] %v1284_v8   ;;  %v1316_v24 = vadd.f32 %v1315_v9, %v1314_v21 }
 0x2b5   : > { %v1317_v22 = vpop.f32.mrf.mxu1 }
 0x2b7   : > { %v1318_v23 = vpop.f32.mrf.mxu1 }
 0x2b8   : > { %v1319_v25 = vadd.f32 %v1318_v23, %v1317_v22 }
 0x2ba   : > { %v1289_v26 = vpack.c.bf16 %v1319_v25, %v1316_v24 }
 0x2bc   : > { %1291 = vst [vmem:[%s253_s17 + $0x8] sm:$0xff] %v1289_v26  }
 0x2bd PF: > { %s16_s21 = sadd.s32 1, %s1479_s21  }
 0x2be   : > { %p13_p4 = scmp.ge.s32.totalorder %s16_s21, 4  }
 0x2c0   :  { %15 = sbr.rel (!%p13_p4) target bundleno = 1 (0x1), region = 74 }

</bundles_post_ra>
